<compile_context>
chip_gen: v7x
topology: tpu7x:2x2x1
jax: 0.10.0
libtpu: 0.0.40
codegen_flags: <defaults>
</compile_context>

<pallas_src>
import jax
import jax.numpy as jnp
import numpy as np
from jax import lax
from jax.experimental import pallas as pl
from jax.experimental.pallas import tpu as pltpu


# ------------------------------ small helpers --------------------------------
def _round_up(x, m):
    return ((x + m - 1) // m) * m


def _vmem_budget_bytes():
    """~3/4 of per-core VMEM: ~48 MiB on v7x (64 MiB/TC), ~96 MiB on v5e/v6e."""
    cap = 64 << 20                      # conservative default if the query fails
    try:
        info = pltpu.get_tpu_info()
        cap = int(getattr(info, "vmem_capacity_bytes", cap) or cap)
    except Exception:
        pass
    return (cap * 3) // 4


def _pick_batch_block(batch, max_gb, *, require_mult8=False):
    """Largest GB dividing `batch` with >= min(4, batch) grid steps and GB <= max_gb.

    `require_mult8` additionally enforces GB % 8 == 0 or GB == batch, which the
    substitution path needs because its cols/invd blocks put the batch on a
    sublane-tiled axis.
    """
    if batch <= 1:
        return 1
    hi = max(1, min(batch, int(max_gb), batch // min(4, batch)))
    for cand in range(hi, 0, -1):
        if batch % cand:
            continue
        if require_mult8 and cand != batch and cand % 8:
            continue
        return cand
    return batch                        # single full-extent block (grid = (1,))


# --------------------------- MXU fast path kernel -----------------------------
def _apply_inverse_kernel(m_ref, b_ref, x_ref):
    """x[g] = M[g] @ b[g] for one block of GB independent systems (MXU)."""
    m = m_ref[...].astype(jnp.float32)              # (GB, n_pad, n_pad)
    rhs = b_ref[...]                                # (GB, n_pad, k)
    x = lax.dot_general(m, rhs, (((2,), (1,)), ((0,), (0,))),
                        preferred_element_type=jnp.float32)
    x_ref[...] = x.astype(x_ref.dtype)


def pallas_apply_inverse(m_all, b_all, *, batch_block, vmem_limit):
    B, n_pad, _ = m_all.shape
    k = b_all.shape[2]
    grid = (B // batch_block,)
    return pl.pallas_call(
        _apply_inverse_kernel,
        out_shape=jax.ShapeDtypeStruct((B, n_pad, k), jnp.float32),
        grid_spec=pltpu.PrefetchScalarGridSpec(
            num_scalar_prefetch=0,
            grid=grid,
            in_specs=[
                pl.BlockSpec((batch_block, n_pad, n_pad), lambda g: (g, 0, 0)),
                pl.BlockSpec((batch_block, n_pad, k), lambda g: (g, 0, 0)),
            ],
            out_specs=pl.BlockSpec((batch_block, n_pad, k), lambda g: (g, 0, 0)),
        ),
        compiler_params=pltpu.CompilerParams(
            dimension_semantics=("parallel",),      # batch blocks are independent
            vmem_limit_bytes=int(vmem_limit),
        ),
    )(m_all, b_all)


# ----------------------- substitution fallback kernel -------------------------
def _substitution_kernel(cols_ref, invd_ref, pb_ref, x_ref):
    """Unit-lower forward + upper back substitution for GB independent systems.

    cols_ref : (n_pad, GB, n_pad)  cols[i, g, r] = LU[g][r, i] for r != i, else 0
    invd_ref : (GB, n_pad)         1 / diag(U)   (1.0 in padded rows)
    pb_ref   : (GB, n_pad, k)      pivot-permuted RHS (zero padded rows)
    x_ref    : (GB, n_pad, k)      solution
    """
    gb, n, k = pb_ref.shape
    unroll = True if n <= 16 else 8
    row = lax.broadcasted_iota(jnp.int32, (1, n, 1), 1)
    invd = invd_ref[...]
    z0 = pb_ref[...]

    # forward substitution L z = Pb (unit lower): only rows r > i are updated.
    def fwd_body(i, z):
        ci = cols_ref[i]                                    # (GB, n_pad)
        zi = lax.dynamic_slice(z, (0, i, 0), (gb, 1, k))    # row i, all RHS cols
        return z - jnp.where(row > i, ci[:, :, None], 0.0) * zi

    z = lax.fori_loop(0, n, fwd_body, z0, unroll=unroll)

    # back substitution U x = z; rows stay un-normalized, 1/diag applied once at end.
    def bwd_body(j, z):
        i = n - 1 - j
        ci = cols_ref[i]
        zi = lax.dynamic_slice(z, (0, i, 0), (gb, 1, k))
        di = lax.dynamic_slice(invd, (0, i), (gb, 1))
        xi = zi * di[:, :, None]                            # solved row i
        return z - jnp.where(row < i, ci[:, :, None], 0.0) * xi

    z = lax.fori_loop(0, n, bwd_body, z, unroll=unroll)
    x_ref[...] = (z * invd[:, :, None]).astype(x_ref.dtype)


def pallas_lu_substitute(cols, invd, pb, *, batch_block, vmem_limit):
    n_pad, B, _ = cols.shape
    k = pb.shape[2]
    grid = (B // batch_block,)
    return pl.pallas_call(
        _substitution_kernel,
        out_shape=jax.ShapeDtypeStruct((B, n_pad, k), jnp.float32),
        grid_spec=pltpu.PrefetchScalarGridSpec(
            num_scalar_prefetch=0,
            grid=grid,
            in_specs=[
                pl.BlockSpec((n_pad, batch_block, n_pad), lambda g: (0, g, 0)),
                pl.BlockSpec((batch_block, n_pad), lambda g: (g, 0)),
                pl.BlockSpec((batch_block, n_pad, k), lambda g: (g, 0, 0)),
            ],
            out_specs=pl.BlockSpec((batch_block, n_pad, k), lambda g: (g, 0, 0)),
        ),
        compiler_params=pltpu.CompilerParams(
            dimension_semantics=("parallel",),
            vmem_limit_bytes=int(vmem_limit),
        ),
    )(cols, invd, pb)


# -------------------------------- module -------------------------------------
class TorchLU:
    """JAX/Pallas equivalent of the PyTorch TorchLU module (forward pass only).

    use_explicit_inverse=True (default): forward is one batched MXU matmul with
    the precomputed M = U^{-1} L^{-1} P.  Set False for the triangular
    substitution kernel (numerically closer to torch.linalg.lu_solve when U is
    ill-conditioned).  inverse_dtype=jnp.bfloat16 optionally halves the HBM
    stream of M (it is cast back to f32 in-kernel).
    """

    def __init__(self, A, *, use_explicit_inverse=True, inverse_dtype=jnp.float32):
        A = jnp.asarray(A, dtype=jnp.float32)
        B, n, _ = A.shape
        self.B, self.n = B, n
        self.n_pad = max(_round_up(n, 8), 8)
        self.use_explicit_inverse = use_explicit_inverse
        self._budget = _vmem_budget_bytes()
        pad_n = self.n_pad - n

        # __init__: LU, P = torch.linalg.lu_factor(A)  (one-time, outside Pallas)
        lu, piv, perm = lax.linalg.lu(A)         # A[g][perm[g]] = L[g] @ U[g]
        self.LU, self.piv, self.perm = lu, piv, perm

        # --- MXU fast path: explicit inverse M = U^{-1} L^{-1} P per batch ----
        eye = jnp.eye(n, dtype=jnp.float32)
        minv = jax.vmap(lambda l, p: jax.scipy.linalg.lu_solve((l, p), eye))(lu, piv)
        minv = jnp.pad(minv, ((0, 0), (0, pad_n), (0, pad_n)))
        self._M = minv.astype(inverse_dtype)

        # --- substitution fallback: single folded off-diagonal column tensor --
        # cols[i, g, r] = LU[g, r, i] for r != i (both strict triangles in one
        # HBM stream); padded rows/steps are zero so the loops can run to n_pad.
        lut = jnp.transpose(lu, (2, 0, 1))                           # (n, B, n)
        idx = jnp.arange(n)
        offdiag = (idx[:, None] != idx[None, :]).astype(jnp.float32)
        cols = lut * offdiag[:, None, :]
        self._cols = jnp.pad(cols, ((0, pad_n), (0, 0), (0, pad_n)))
        invd = 1.0 / jnp.diagonal(lu, axis1=1, axis2=2)              # (B, n)
        self._invd = jnp.pad(invd, ((0, 0), (0, pad_n)), constant_values=1.0)

    def __call__(self, A, b):
        # forward(A, b): A is unused at call time - LU/P/M are precomputed,
        # matching torch's TorchLULayer when LU and P are supplied.
        b = jnp.asarray(b, dtype=jnp.float32)
        B, n, k = b.shape
        assert B == self.B and n == self.n, "b inconsistent with factored A"
        pad_n = self.n_pad - n
        budget = self._budget

        if self.use_explicit_inverse:
            bp = jnp.pad(b, ((0, 0), (0, pad_n), (0, 0))) if pad_n else b
            per_batch = (self.n_pad * self.n_pad * self._M.dtype.itemsize
                         + 2 * self.n_pad * k * 4)
            gb = _pick_batch_block(B, max(1, int(budget * 0.45) // per_batch))
            x = pallas_apply_inverse(self._M, bp, batch_block=gb, vmem_limit=budget)
        else:
            # pivot row interchanges (cheap gather over n*B*k elements)
            pb = jnp.take_along_axis(b, self.perm[:, :, None], axis=1)
            if pad_n:
                pb = jnp.pad(pb, ((0, 0), (0, pad_n), (0, 0)))
            per_batch = (self.n_pad * self.n_pad * 4 + self.n_pad * 4
                         + 2 * self.n_pad * k * 4)
            max_mem = max(1, int(budget * 0.45) // per_batch)
            # keep the loop-carried z (GB, n_pad, k) within ~16 vregs
            max_live = max(1, (64 * 1024) // (self.n_pad * k * 4))
            gb = _pick_batch_block(B, min(max_mem, max_live), require_mult8=True)
            x = pallas_lu_substitute(self._cols, self._invd, pb,
                                     batch_block=gb, vmem_limit=budget)
        return x[:, :n, :] if pad_n else x


# --------------------------------- main ---------------------------------------
if __name__ == "__main__":
    key = jax.random.PRNGKey(0)
    B, n, k = 2, 20, 3                   # n not a multiple of 8: exercises padding

    kA, kb = jax.random.split(key)
    R = jax.random.normal(kA, (B, n, n), dtype=jnp.float32)
    # symmetric, well-conditioned A (the torch backward derivation assumes symmetric A)
    A = jnp.matmul(R, jnp.swapaxes(R, 1, 2)) + n * jnp.eye(n, dtype=jnp.float32)
    b = jax.random.normal(kb, (B, n, k), dtype=jnp.float32)

    x_ref = jnp.linalg.solve(A, b)

    # default MXU path (precomputed explicit inverse, permutation folded into M)
    layer = TorchLU(A)
    x = jax.block_until_ready(layer(A, b))
    np.testing.assert_allclose(np.asarray(x), np.asarray(x_ref), rtol=1e-4, atol=1e-4)

    # substitution fallback path (kept for ill-conditioned systems)
    layer_fb = TorchLU(A, use_explicit_inverse=False)
    x_fb = jax.block_until_ready(layer_fb(A, b))
    np.testing.assert_allclose(np.asarray(x_fb), np.asarray(x_ref), rtol=1e-4, atol=1e-4)

    print("KERNEL_OK")
</pallas_src>

<mosaic_0001>
module attributes {stable_mosaic.version = 11 : i64} {
  func.func @_apply_inverse_kernel(%arg0: i32, %arg1: memref<1x24x24xf32, #tpu.memory_space<vmem>>, %arg2: memref<1x24x3xf32, #tpu.memory_space<vmem>>, %arg3: memref<1x24x3xf32, #tpu.memory_space<vmem>>) attributes {dimension_semantics = [#tpu.dimension_semantics<parallel>], iteration_bounds = array<i64: 2>, scalar_prefetch = 0 : i64, scratch_operands = 0 : i64, tpu.core_type = #tpu.core_type<tc>, window_params = [{transform_indices = @transform_0, window_bounds = array<i64: 1, 24, 24>}, {transform_indices = @transform_1, window_bounds = array<i64: 1, 24, 3>}, {transform_indices = @transform_2, window_bounds = array<i64: 1, 24, 3>}]} {
    %c0 = arith.constant 0 : index
    %c0_0 = arith.constant 0 : index
    %c0_1 = arith.constant 0 : index
    %0 = vector.load %arg1[%c0, %c0_0, %c0_1] : memref<1x24x24xf32, #tpu.memory_space<vmem>>, vector<1x24x24xf32>
    %c0_2 = arith.constant 0 : index
    %c0_3 = arith.constant 0 : index
    %c0_4 = arith.constant 0 : index
    %1 = vector.load %arg2[%c0_2, %c0_3, %c0_4] : memref<1x24x3xf32, #tpu.memory_space<vmem>>, vector<1x24x3xf32>
    %cst = arith.constant dense<0.000000e+00> : vector<1x24x3xf32>
    %2 = tpu.matmul %0, %1, %cst {dimension_numbers = #tpu.dot_dimension_numbers<[2], [1], [1], [2], [0, 0, 0, 1, 1, 2], [0], [0]>} : vector<1x24x24xf32>, vector<1x24x3xf32>, vector<1x24x3xf32> -> vector<1x24x3xf32>
    %c0_5 = arith.constant 0 : index
    %c0_6 = arith.constant 0 : index
    %c0_7 = arith.constant 0 : index
    %3 = vector.load %arg3[%c0_5, %c0_6, %c0_7] : memref<1x24x3xf32, #tpu.memory_space<vmem>>, vector<1x24x3xf32>
    tpu.vector_store %arg3[%c0_5, %c0_6, %c0_7], %2 {strides = array<i32>} : memref<1x24x3xf32, #tpu.memory_space<vmem>>, vector<1x24x3xf32>,
    return
  }
  func.func @transform_0(%arg0: i32) -> (i32, i32, i32) {
    %c0_i32 = arith.constant 0 : i32
    %c0_i32_0 = arith.constant 0 : i32
    %c0_i32_1 = arith.constant 0 : i32
    return %arg0, %c0_i32, %c0_i32_0 : i32, i32, i32
  }
  func.func @transform_1(%arg0: i32) -> (i32, i32, i32) {
    %c0_i32 = arith.constant 0 : i32
    %c0_i32_0 = arith.constant 0 : i32
    %c0_i32_1 = arith.constant 0 : i32
    return %arg0, %c0_i32, %c0_i32_0 : i32, i32, i32
  }
  func.func @transform_2(%arg0: i32) -> (i32, i32, i32) {
    %c0_i32 = arith.constant 0 : i32
    %c0_i32_0 = arith.constant 0 : i32
    %c0_i32_1 = arith.constant 0 : i32
    return %arg0, %c0_i32, %c0_i32_0 : i32, i32, i32
  }
}

</mosaic_0001>

<bundles_post_ra>
// kernel: tpu_custom_call.1
= control target key start
LH: loop header
LB: loop body
LE: loop exit
PB: predicated region body
PF: predicated region fallthrough
CT: control target
= control target key end

     0   :  { %s410_s9 = smov 0   ;;  %s433_s0 = inlined_call_operand.vmem [shape: f32[2,24,24], index: 0, kind: input, shape index: {}]   ;;  %s434_s1 = inlined_call_operand.vmem [shape: f32[2,24,3], index: 1, kind: input, shape index: {}]   ;;  %s435_s2 = inlined_call_operand.vmem [shape: f32[2,24,3], index: 2, kind: output, shape index: {}]  }
   0x1 LB: > { %s331_s10 = sadd.s32 4294967295, %s390_s9   ;;  %p335_p0 = scmp.ge.s32.totalorder %s390_s9, 1  ;;  %s390_s9 = sphi %s410_s9, %s12_s9  }
   0x2   : > { %p122_p1 = scmp.lt.s32.totalorder %s390_s9, 3 }
   0x4   : > { %p123_p2 = pnand %p335_p0, %p122_p1 }
   0x5   : > { %p149_p3 = scmp.lt.s32.totalorder (!%p123_p2), %s331_s10, 1  ;;  %v392_v0 = vmov (!%p123_p2), 0.0|0.0   ;;  %vm393_vm0 = vmmov (!%p123_p2), 0   ;;  %v394_v1 = vmov (!%p123_p2), 0.0   ;;  %vm170_vm1 = vcmask (!%p123_p2), 195584  }
   0x6   : > { %126 = sbr.rel (%p123_p2) target bundleno = 242 (0xf2), region = 28  ;;  %368 = vmatprep.subr.bf16.mxu1 (!%p123_p2), %v392_v0  ;;  %365 = vmatprep.subr.bf16.mxu0 (!%p123_p2), %v392_v0  ;;  %vm260_vm2 = vcmask (!%p123_p2), 23552  }
   0x7   : > { %359 = vmatprep.mubr.msk.f32.mxu1 (!%p123_p2), %vm393_vm0, %v394_v1  ;;  %356 = vmatprep.mubr.msk.f32.mxu0 (!%p123_p2), %vm393_vm0, %v394_v1 }
   0xd   : > { %s437_s10 = smov (!%p149_p3, %s331_s10), 1 }
   0xe   : > { %s372_s11 = smul.u32 24, %s437_s10 }
  0x10   : > { %s158_s14 = scalar_lea.vmem %s434_s1, %s372_s11  ;;  %s153_s17 = scalar_lea.vmem %s433_s0, %s372_s11 }
  0x11   : > { %v167_v2 = vld [vmem:[%s158_s14] sm:$0xff]  ;;  %v168_v3 = vld [vmem:[%s158_s14 + $0x8] sm:$0xff]  ;;  %v169_v5 = vld [vmem:[%s158_s14 + $0x10] sm:$0xff]  ;;  %s163_s20 = scalar_lea.vmem %s435_s2, %s372_s11 }
  0x12   : > { %v366_v4 = vpack.c.bf16 %v168_v3, %v167_v2  ;;  %v165_v6 = vld [vmem:[%s153_s17 + $0x8] sm:$0xff]  ;;  %v164_v7 = vld [vmem:[%s153_s17] sm:$0xff]  ;;  %v166_v8 = vld [vmem:[%s153_s17 + $0x10] sm:$0xff] }
  0x14   : > { %370 = vmatpush3.bf16.msra.mxu1 %v366_v4  ;;  %367 = vmatpush3.bf16.msra.mxu0 %v366_v4 }
  0x15   : > { %369 = vmatprep.subr.mxu1 %v394_v1  ;;  %354 = vmatprep.subr.mxu0 %v394_v1 }
  0x18   : > { %371 = vmatpush3.msra.mxu1 %v169_v5  ;;  %355 = vmatpush3.msra.mxu0 %v169_v5 }
  0x19   : > { %360 = vmatmul.mubr.msk.f32.vlgmr.msra.gmra.mrb[0].mxu1 %vm170_vm1, %v165_v6  ;;  %357 = vmatmul.mubr.msk.f32.vlgmr.msra.gmra.mrb[0].mxu0 %vm170_vm1, %v164_v7 }
  0x1a   : > { %362 = vmatprep.mubr.msk.f32.mxu1 %vm393_vm0, %v394_v1 }
  0x1d   : > { %363 = vmatmul.mubr.msk.f32.gmra.mrb[2].mxu1 %vm170_vm1, %v166_v8 }
  0xec   : > { %v251_v9 = vpop.f32.mrb[0].mxu1  ;;  %v246_v10 = vpop.f32.mrb[0].mxu0 }
  0xed   : > { %262 = vst.msk [vmem:[%s163_s20 + $0x8] sm:$0xff] %vm260_vm2, %v251_v9  ;;  %v361_v11 = vpop.f32.mrb[1].mxu1  ;;  %261 = vst.msk [vmem:[%s163_s20] sm:$0xff] %vm260_vm2, %v246_v10  ;;  %v358_v12 = vpop.f32.mrb[1].mxu0 }
  0xf0   : > { %v256_v13 = vpop.f32.mrb[2].mxu1 }
  0xf1   : > { %263 = vst.msk [vmem:[%s163_s20 + $0x10] sm:$0xff] %vm260_vm2, %v256_v13  ;;  %v364_v14 = vpop.f32.mrb[3].mxu1 }
  0xf2 PF: > { %s12_s9 = sadd.s32 1, %s390_s9  }
  0xf3   : > { %p9_p4 = scmp.ge.s32.totalorder %s12_s9, 4  }
  0xf5   :  { %11 = sbr.rel (!%p9_p4) target bundleno = 1 (0x1), region = 61 }

</bundles_post_ra>
